<compile_context>
chip_gen: v7x
topology: tpu7x:2x2x1
jax: 0.10.0
libtpu: 0.0.40
codegen_flags: <defaults>
</compile_context>

<pallas_src>
import functools
import math

import jax
import jax.numpy as jnp
from jax.experimental import pallas as pl
from jax.experimental.pallas import tpu as pltpu


def _linear_with_channel_kernel(x_ref, w_ref, b_ref, o_ref, *, cb, in_size, out_size):
    """One grid step == one block of `cb` channels.

    x_ref: (B, cb*I)   compute dtype (bf16 by default)
    w_ref: (cb, I, O)  compute dtype
    b_ref: (1, cb*O)   float32
    o_ref: (B, cb*O)   float32
    """
    x_full = x_ref[...]                                   # (B, cb*I), one dense load
    w_full = w_ref[...]                                   # (cb, I, O)

    outs = []
    for c in range(cb):                                   # small static unroll
        xc = x_full[:, c * in_size:(c + 1) * in_size]     # (B, I)
        wc = w_full[c]                                    # (I, O)
        outs.append(jnp.dot(xc, wc, preferred_element_type=jnp.float32))  # MXU, f32

    acc = outs[0] if cb == 1 else jnp.concatenate(outs, axis=-1)          # (B, cb*O)
    # Single full-width bias add + one lane-dense store.
    o_ref[...] = (acc + b_ref[...]).astype(o_ref.dtype)


def linear_with_channel(x, w, b, *, channel_block=None, use_bf16=True):
    """x: (B, C, I); w: (C, I, O); b: (1, C, O) -> (B, C, O) float32."""
    B, C, I = x.shape
    Cw, Iw, O = w.shape
    assert (C, I) == (Cw, Iw)
    assert b.shape == (1, C, O)

    if channel_block is None:
        channel_block = C                      # whole channel axis in one grid step
    assert C % channel_block == 0
    if channel_block != C:
        # sub-blocks of the lane-flattened arrays must stay 128-lane aligned
        assert (channel_block * I) % 128 == 0 and (channel_block * O) % 128 == 0

    compute_dtype = jnp.bfloat16 if use_bf16 else x.dtype

    # Free row-major reshapes: lane-flatten the channel axis into the minor dim so
    # every DMA block (input and output) is lane-dense.  Casts halve HBM traffic.
    x_flat = x.reshape(B, C * I).astype(compute_dtype)     # (B, C*I)
    w_c = w.astype(compute_dtype)                          # (C, I, O)
    b_flat = b.reshape(1, C * O).astype(jnp.float32)       # (1, C*O)

    kernel = functools.partial(
        _linear_with_channel_kernel, cb=channel_block, in_size=I, out_size=O
    )

    grid = (C // channel_block,)

    out_flat = pl.pallas_call(
        kernel,
        out_shape=jax.ShapeDtypeStruct((B, C * O), jnp.float32),
        grid_spec=pltpu.PrefetchScalarGridSpec(
            num_scalar_prefetch=0,
            grid=grid,
            in_specs=[
                pl.BlockSpec((B, channel_block * I), lambda g: (0, g)),
                pl.BlockSpec((channel_block, Iw, O), lambda g: (g, 0, 0)),
                pl.BlockSpec((1, channel_block * O), lambda g: (0, g)),
            ],
            out_specs=pl.BlockSpec((B, channel_block * O), lambda g: (0, g)),
        ),
        compiler_params=pltpu.CompilerParams(
            dimension_semantics=("parallel",),
        ),
    )(x_flat, w_c, b_flat)

    return out_flat.reshape(B, C, O)           # free reshape back to (B, C, O)


def init_params(key, input_size, output_size, channel_size, dtype=jnp.float32):
    """Deterministic init mirroring the PyTorch module's reset_parameters."""
    kw, kb = jax.random.split(key)
    # kaiming_uniform_(w, a=sqrt(3)) on a (C, I, O) tensor:
    #   fan_in = I * O, gain = sqrt(2 / (1 + a^2)) = sqrt(0.5)
    #   bound_w = sqrt(3) * gain / sqrt(fan_in)
    fan_in = input_size * output_size
    bound_w = math.sqrt(3.0) * math.sqrt(0.5) / math.sqrt(fan_in)
    w = jax.random.uniform(
        kw, (channel_size, input_size, output_size), dtype,
        minval=-bound_w, maxval=bound_w)
    bound_b = 1.0 / math.sqrt(fan_in)
    b = jax.random.uniform(
        kb, (1, channel_size, output_size), dtype,
        minval=-bound_b, maxval=bound_b)
    return w, b


if __name__ == "__main__":
    batch, channel, input_size, output_size = 8, 4, 32, 32

    key = jax.random.PRNGKey(0)
    kx, kp = jax.random.split(key)
    x = jax.random.normal(kx, (batch, channel, input_size), jnp.float32)
    w, b = init_params(kp, input_size, output_size, channel)

    out = jax.block_until_ready(linear_with_channel(x, w, b))
    assert out.shape == (batch, channel, output_size)

    # Reference 1: same compute precision as the kernel (bf16-rounded inputs, f32 math).
    xr = x.astype(jnp.bfloat16).astype(jnp.float32)
    wr = w.astype(jnp.bfloat16).astype(jnp.float32)
    ref_bf16 = jnp.einsum("bci,cio->bco", xr, wr) + b     # b (1,C,O) broadcasts over batch
    assert jnp.allclose(out, ref_bf16, atol=2e-3, rtol=2e-3)

    # Reference 2: full-f32 PyTorch semantics; only bf16 input rounding differs.
    ref_f32 = jnp.einsum("bci,cio->bco", x, w) + b
    assert jnp.allclose(out, ref_f32, atol=5e-2, rtol=5e-2)

    print("KERNEL_OK")
</pallas_src>

<mosaic_0001>
module attributes {stable_mosaic.version = 11 : i64} {
  func.func @_linear_with_channel_kernel(%arg0: i32, %arg1: memref<8x128xbf16, #tpu.memory_space<vmem>>, %arg2: memref<4x32x32xbf16, #tpu.memory_space<vmem>>, %arg3: memref<1x128xf32, #tpu.memory_space<vmem>>, %arg4: memref<8x128xf32, #tpu.memory_space<vmem>>) attributes {dimension_semantics = [#tpu.dimension_semantics<parallel>], iteration_bounds = array<i64: 1>, scalar_prefetch = 0 : i64, scratch_operands = 0 : i64, tpu.core_type = #tpu.core_type<tc>, window_params = [{transform_indices = @transform_0, window_bounds = array<i64: 8, 128>}, {transform_indices = @transform_1, window_bounds = array<i64: 4, 32, 32>}, {transform_indices = @transform_2, window_bounds = array<i64: 1, 128>}, {transform_indices = @transform_3, window_bounds = array<i64: 8, 128>}]} {
    %c0 = arith.constant 0 : index
    %c0_0 = arith.constant 0 : index
    %0 = vector.load %arg1[%c0, %c0_0] : memref<8x128xbf16, #tpu.memory_space<vmem>>, vector<8x128xbf16>
    %c0_1 = arith.constant 0 : index
    %c0_2 = arith.constant 0 : index
    %c0_3 = arith.constant 0 : index
    %1 = vector.load %arg2[%c0_1, %c0_2, %c0_3] : memref<4x32x32xbf16, #tpu.memory_space<vmem>>, vector<4x32x32xbf16>
    %2 = vector.extract_strided_slice %0 {offsets = [0, 0], sizes = [8, 32], strides = [1, 1]} : vector<8x128xbf16> to vector<8x32xbf16>
    %3 = vector.extract_strided_slice %1 {offsets = [0, 0, 0], sizes = [1, 32, 32], strides = [1, 1, 1]} : vector<4x32x32xbf16> to vector<1x32x32xbf16>
    %4 = vector.shape_cast %3 : vector<1x32x32xbf16> to vector<32x32xbf16>
    %cst = arith.constant dense<0.000000e+00> : vector<8x32xf32>
    %5 = tpu.matmul %2, %4, %cst {dimension_numbers = #tpu.dot_dimension_numbers<[1], [0], [0], [1], [0, 0, 1, 1], [], []>} : vector<8x32xbf16>, vector<32x32xbf16>, vector<8x32xf32> -> vector<8x32xf32>
    %6 = vector.extract_strided_slice %0 {offsets = [0, 32], sizes = [8, 32], strides = [1, 1]} : vector<8x128xbf16> to vector<8x32xbf16>
    %7 = vector.extract_strided_slice %1 {offsets = [1, 0, 0], sizes = [1, 32, 32], strides = [1, 1, 1]} : vector<4x32x32xbf16> to vector<1x32x32xbf16>
    %8 = vector.shape_cast %7 : vector<1x32x32xbf16> to vector<32x32xbf16>
    %cst_4 = arith.constant dense<0.000000e+00> : vector<8x32xf32>
    %9 = tpu.matmul %6, %8, %cst_4 {dimension_numbers = #tpu.dot_dimension_numbers<[1], [0], [0], [1], [0, 0, 1, 1], [], []>} : vector<8x32xbf16>, vector<32x32xbf16>, vector<8x32xf32> -> vector<8x32xf32>
    %10 = vector.extract_strided_slice %0 {offsets = [0, 64], sizes = [8, 32], strides = [1, 1]} : vector<8x128xbf16> to vector<8x32xbf16>
    %11 = vector.extract_strided_slice %1 {offsets = [2, 0, 0], sizes = [1, 32, 32], strides = [1, 1, 1]} : vector<4x32x32xbf16> to vector<1x32x32xbf16>
    %12 = vector.shape_cast %11 : vector<1x32x32xbf16> to vector<32x32xbf16>
    %cst_5 = arith.constant dense<0.000000e+00> : vector<8x32xf32>
    %13 = tpu.matmul %10, %12, %cst_5 {dimension_numbers = #tpu.dot_dimension_numbers<[1], [0], [0], [1], [0, 0, 1, 1], [], []>} : vector<8x32xbf16>, vector<32x32xbf16>, vector<8x32xf32> -> vector<8x32xf32>
    %14 = vector.extract_strided_slice %0 {offsets = [0, 96], sizes = [8, 32], strides = [1, 1]} : vector<8x128xbf16> to vector<8x32xbf16>
    %15 = vector.extract_strided_slice %1 {offsets = [3, 0, 0], sizes = [1, 32, 32], strides = [1, 1, 1]} : vector<4x32x32xbf16> to vector<1x32x32xbf16>
    %16 = vector.shape_cast %15 : vector<1x32x32xbf16> to vector<32x32xbf16>
    %cst_6 = arith.constant dense<0.000000e+00> : vector<8x32xf32>
    %17 = tpu.matmul %14, %16, %cst_6 {dimension_numbers = #tpu.dot_dimension_numbers<[1], [0], [0], [1], [0, 0, 1, 1], [], []>} : vector<8x32xbf16>, vector<32x32xbf16>, vector<8x32xf32> -> vector<8x32xf32>
    %18 = tpu.concatenate %5, %9, %13, %17 in 1 : vector<8x32xf32>, vector<8x32xf32>, vector<8x32xf32>, vector<8x32xf32> -> vector<8x128xf32>
    %c0_7 = arith.constant 0 : index
    %c0_8 = arith.constant 0 : index
    %19 = vector.load %arg3[%c0_7, %c0_8] : memref<1x128xf32, #tpu.memory_space<vmem>>, vector<1x128xf32>
    %20 = vector.broadcast %19 : vector<1x128xf32> to vector<8x128xf32>
    %21 = arith.addf %18, %20 : vector<8x128xf32>
    %c0_9 = arith.constant 0 : index
    %c0_10 = arith.constant 0 : index
    %22 = vector.load %arg4[%c0_9, %c0_10] : memref<8x128xf32, #tpu.memory_space<vmem>>, vector<8x128xf32>
    tpu.vector_store %arg4[%c0_9, %c0_10], %21 {strides = array<i32>} : memref<8x128xf32, #tpu.memory_space<vmem>>, vector<8x128xf32>,
    return
  }
  func.func @transform_0(%arg0: i32) -> (i32, i32) {
    %c0_i32 = arith.constant 0 : i32
    %c0_i32_0 = arith.constant 0 : i32
    return %c0_i32, %arg0 : i32, i32
  }
  func.func @transform_1(%arg0: i32) -> (i32, i32, i32) {
    %c0_i32 = arith.constant 0 : i32
    %c0_i32_0 = arith.constant 0 : i32
    %c0_i32_1 = arith.constant 0 : i32
    return %arg0, %c0_i32, %c0_i32_0 : i32, i32, i32
  }
  func.func @transform_2(%arg0: i32) -> (i32, i32) {
    %c0_i32 = arith.constant 0 : i32
    %c0_i32_0 = arith.constant 0 : i32
    return %c0_i32, %arg0 : i32, i32
  }
  func.func @transform_3(%arg0: i32) -> (i32, i32) {
    %c0_i32 = arith.constant 0 : i32
    %c0_i32_0 = arith.constant 0 : i32
    return %c0_i32, %arg0 : i32, i32
  }
}

</mosaic_0001>

<bundles_post_ra>
// kernel: tpu_custom_call.1
= control target key start
LH: loop header
LB: loop body
LE: loop exit
PB: predicated region body
PF: predicated region fallthrough
CT: control target
= control target key end

     0   :  { %8 = vsyncpa [#allocation3], 0  ;;  %s571_s0 = inlined_call_operand.hbm [shape: bf16[8,128], index: 0, kind: input, shape index: {}]   ;;  %s572_s1 = inlined_call_operand.hbm [shape: bf16[4,32,32], index: 1, kind: input, shape index: {}]   ;;  %s573_s2 = inlined_call_operand.vmem [shape: f32[1,128], index: 2, kind: input, shape index: {}]   ;;  %s574_s3 = inlined_call_operand.hbm [shape: f32[8,128], index: 3, kind: output, shape index: {}]  }
   0x1   :  { %9 = vsyncpa [#allocation6], 0 }
   0x2   :  { %10 = vsyncpa [#allocation4], 0  ;;  %s479_s12 = smov [#allocation2]   ;;  %s480_s14 = smov [#allocation5]  }
   0x3   :  { %s17_s13 = sshll.u32 %s479_s12, 4  ;;  %s26_s15 = sshll.u32 %s480_s14, 4  ;;  %s18_s13 = int_to_ptr.vmem [resolvable:$true] %s17_s13  ;;  %s508_s15 = int_to_ptr.vmem [resolvable:$true] %s26_s15 }
   0x4   :  { %s407_s18 = scalar_lea.hbm %s571_s0, 64 }
   0x5   :  { %p408_p0 = scmp.ne.s32.totalorder %s571_s0, %s407_s18  ;;  %p411_p1 = scmp.lt.u32.totalorder %s407_s18, %s571_s0 }
   0x7   :  { %p413_p2 = pnand %p411_p1, %p408_p0 }
   0x9   :  { %416 = shalt.err (!%p413_p2)
}
   0xa   :  { %s417_s23 = scalar_lea.vmem %s18_s13, 64  ;;  %p422_p4 = scmp.lt.s32.totalorder %s18_s13, %s18_s13 }
   0xb   :  { %p418_p3 = scmp.ne.s32.totalorder %s18_s13, %s417_s23  ;;  %p423_p5 = scmp.lt.s32.totalorder %s417_s23, %s417_s23 }
   0xd   :  { %p424_p6 = por %p423_p5, %p422_p4 }
   0xf   :  { %p425_p7 = pnand %p424_p6, %p418_p3 }
  0x11   :  { %428 = shalt.err (!%p425_p7)
}
  0x12   :  { %20 = dma.hbm_to_vmem [thread:$0]  %s571_s0, 64, %s18_s13, [#allocation3]  }
  0x13   :  { %s429_s28 = scalar_lea.hbm %s572_s1, 1024 }
  0x14   :  { %p430_p8 = scmp.ne.s32.totalorder %s572_s1, %s429_s28  ;;  %p433_p9 = scmp.lt.u32.totalorder %s429_s28, %s572_s1 }
  0x16   :  { %p435_p10 = pnand %p433_p9, %p430_p8 }
  0x18   :  { %438 = shalt.err (!%p435_p10)
}
  0x19   :  { %s439_s6 = scalar_lea.vmem %s508_s15, 1024  ;;  %p444_p12 = scmp.lt.s32.totalorder %s508_s15, %s508_s15 }
  0x1a   :  { %p440_p11 = scmp.ne.s32.totalorder %s508_s15, %s439_s6  ;;  %p445_p13 = scmp.lt.s32.totalorder %s439_s6, %s439_s6 }
  0x1c   :  { %p446_p0 = por %p445_p13, %p444_p12 }
  0x1e   :  { %p447_p1 = pnand %p446_p0, %p440_p11 }
  0x20   :  { %450 = shalt.err (!%p447_p1)
}
  0x21   :  { %s481_s0 = smov 64   ;;  %s482_s7 = smov 4  }
  0x22   :  { %32 = dma.hbm_to_vmem [thread:$0]  %s572_s1, 1024, %s508_s15, [#allocation6], %s481_s0, %s481_s0, %s482_s7  }
  0x23   :  { %473 = dma.done.wait [#allocation3], 64  }
  0x24   :  { %474 = vsyncadd [#allocation3], 4294967232 }
  0x25   :  { %475 = dma.done.wait [#allocation6], 1024  }
  0x26   :  { %476 = vsyncadd [#allocation6], 4294966272  ;;  %v483_v0 = vmov 0.0   ;;  %vm484_vm0 = vmmov 0   ;;  %v42_v1 = vld [vmem:[#allocation2] sm:$0xf] }
  0x27   :  { %357 = vmatprep.subr.bf16.mxu0 %v483_v0  ;;  %365 = vmatprep.subr.bf16.mxu1 %v483_v0  ;;  %v334_v2 = vcombine.low %v42_v1, %v42_v1  ;;  %v399_v3 = vld [vmem:[#allocation5] sm:$0xff]   ;;  %v400_v4 = vld [vmem:[#allocation5 + $0x10] sm:$0xff]   ;;  %s485_s10 = smov 96   ;;  %s486_s1 = smov 32   ;;  %v401_v5 = vld [vmem:[#allocation5 + $0x8] sm:$0xff]   ;;  %vm71_vm1 = vcmask 261120  }
  0x28   :  { %361 = vmatprep.mubr.msk.bf16.mxu0 %vm484_vm0, %v483_v0  ;;  %369 = vmatprep.mubr.msk.bf16.mxu1 %vm484_vm0, %v483_v0  ;;  %v402_v6 = vld [vmem:[#allocation5 + $0x18] sm:$0xff]   ;;  %v403_v7 = vld [vmem:[#allocation5 + $0x20] sm:$0xff]   ;;  %v405_v8 = vld [vmem:[#allocation5 + $0x28] sm:$0xff]   ;;  %vm302_vm2 = vcmask 523264   ;;  %vm304_vm3 = vcmask 785408   ;;  %s487_s13 = smov [#allocation7]  }
  0x29   :  { %118 = vrot.lane.b32.xlu0 %v334_v2, %s485_s10  ;;  %232 = vrot.lane.b32.xlu1 %v334_v2, %s486_s1  ;;  %v404_v9 = vld [vmem:[#allocation5 + $0x30] sm:$0xff]   ;;  %v406_v11 = vld [vmem:[#allocation5 + $0x38] sm:$0xff]   ;;  %s321_s14 = sshll.u32 %s487_s13, 4  ;;  %s322_s14 = int_to_ptr.vmem [resolvable:$true] %s321_s14 }
  0x2a   :  { %358 = vmatpush3.bf16.msra.mxu0 %v399_v3  ;;  %366 = vmatpush3.bf16.msra.mxu1 %v400_v4  ;;  %v344_v33 = vld [vmem:[%s573_s2] ss:$0 sm:$0xff]  ;;  %s451_s15 = scalar_lea.vmem %s322_s14, 128  ;;  %p456_p3 = scmp.lt.s32.totalorder %s322_s14, %s322_s14 }
  0x2b   :  { %359 = vmatprep.subr.bf16.mxu0 %v483_v0  ;;  %367 = vmatprep.subr.bf16.mxu1 %v483_v0  ;;  %p452_p2 = scmp.ne.s32.totalorder %s322_s14, %s451_s15  ;;  %p457_p4 = scmp.lt.s32.totalorder %s451_s15, %s451_s15 }
  0x2d   :  { %175 = vrot.lane.b32.xlu0 %v334_v2, %s481_s0  ;;  %p458_p5 = por %p457_p4, %p456_p3 }
  0x2e   :  { %360 = vmatpush3.bf16.msra.mxu0 %v401_v5  ;;  %368 = vmatpush3.bf16.msra.mxu1 %v402_v6 }
  0x2f   :  { %373 = vmatprep.subr.bf16.mxu0 %v483_v0  ;;  %381 = vmatprep.subr.bf16.mxu1 %v483_v0  ;;  %p459_p6 = pnand %p458_p5, %p452_p2 }
  0x31   :  { %362 = vmatmul.mubr.msk.bf16.vlgmr.msra.gmra.mrb[0].mxu0 %vm71_vm1, %v42_v1 }
  0x32   :  { %374 = vmatpush3.bf16.msra.mxu0 %v403_v7  ;;  %377 = vmatprep.mubr.msk.bf16.mxu0 %vm484_vm0, %v483_v0 }
  0x33   :  { %375 = vmatprep.subr.bf16.mxu0 %v483_v0 }
  0x36   :  { %376 = vmatpush3.bf16.msra.mxu0 %v405_v8 }
  0x9b   :  { %v119_v10 = vpop.permute.xlu0 %118  ;;  %v233_v13 = vpop.permute.xlu1 %232 }
  0x9c   :  { %370 = vmatmul.mubr.msk.bf16.vlgmr.msra.gmra.mrb[0].mxu1 %vm71_vm1, %v119_v10 }
  0x9d   :  { %382 = vmatpush3.bf16.msra.mxu1 %v404_v9  ;;  %385 = vmatprep.mubr.msk.bf16.mxu1 %vm484_vm0, %v483_v0 }
  0x9e   :  { %383 = vmatprep.subr.bf16.mxu1 %v483_v0 }
  0x9f   :  { %v176_v12 = vpop.permute.xlu0 %175 }
  0xa0   :  { %378 = vmatmul.mubr.msk.bf16.vlgmr.msra.gmra.mrb[4].mxu0 %vm71_vm1, %v176_v12 }
  0xa1   :  { %384 = vmatpush3.bf16.msra.mxu1 %v406_v11 }
  0xa4   :  { %386 = vmatmul.mubr.msk.bf16.vlgmr.msra.gmra.mrb[4].mxu1 %vm71_vm1, %v233_v13 }
 0x104   :  { %v109_v14 = vpop.f32.mrb[0].mxu0 }
 0x105   :  { %v363_v15 = vpop.f32.mrb[1].mxu0 }
 0x106   :  { %v112_v16 = vpop.f32.mrb[2].mxu0 }
 0x107   :  { %v364_v17 = vpop.f32.mrb[3].mxu0 }
 0x16f   :  { %v169_v18 = vpop.f32.mrb[0].mxu1 }
 0x170   :  { %290 = vrot.lane.b32.xlu1 %v169_v18, %s486_s1  ;;  %v371_v19 = vpop.f32.mrb[1].mxu1 }
 0x171   :  { %v172_v20 = vpop.f32.mrb[2].mxu1 }
 0x172   :  { %v372_v21 = vpop.f32.mrb[3].mxu1 }
 0x173   :  { %v226_v22 = vpop.f32.mrb[4].mxu0 }
 0x174   :  { %294 = vrot.lane.b32.xlu0 %v226_v22, %s481_s0  ;;  %v379_v23 = vpop.f32.mrb[5].mxu0 }
 0x175   :  { %v229_v24 = vpop.f32.mrb[6].mxu0 }
 0x176   :  { %v380_v25 = vpop.f32.mrb[7].mxu0 }
 0x177   :  { %v283_v26 = vpop.f32.mrb[4].mxu1 }
 0x178   :  { %298 = vrot.lane.b32.xlu1 %v283_v26, %s485_s10  ;;  %v387_v27 = vpop.f32.mrb[5].mxu1 }
 0x179   :  { %v286_v28 = vpop.f32.mrb[6].mxu1 }
 0x17a   :  { %v388_v29 = vpop.f32.mrb[7].mxu1 }
 0x1e2   :  { %v291_v30 = vpop.permute.xlu1 %290 }
 0x1e3   :  { %v301_v32 = vsel %vm71_vm1, %v109_v14, %v291_v30 }
 0x1e6   :  { %v295_v31 = vpop.permute.xlu0 %294 }
 0x1e7   :  { %v303_v34 = vsel %vm302_vm2, %v301_v32, %v295_v31 }
 0x1ea   :  { %v299_v35 = vpop.permute.xlu1 %298 }
 0x1eb   :  { %v305_v36 = vsel %vm304_vm3, %v303_v34, %v299_v35 }
 0x1ec   :  { %v313_v37 = vadd.f32 %v344_v33, %v305_v36 }
 0x1ee   :  { %314 = vst [vmem:[#allocation7] sm:$0xff] %v313_v37 }
 0x1ef   :  { %462 = shalt.err (!%p459_p6)
}
 0x1f0   :  { %s463_s18 = scalar_lea.hbm %s574_s3, 128 }
 0x1f1   :  { %p464_p7 = scmp.ne.s32.totalorder %s574_s3, %s463_s18  ;;  %p467_p8 = scmp.lt.u32.totalorder %s463_s18, %s574_s3 }
 0x1f3   :  { %p469_p9 = pnand %p467_p8, %p464_p7 }
 0x1f5   :  { %472 = shalt.err (!%p469_p9)
}
 0x1f6   :  { %324 = dma.vmem_to_hbm [thread:$0]  %s322_s14, 128, %s574_s3, [#allocation4]  }
 0x1f7   :  { %477 = dma.done.wait [#allocation4], 128  }
 0x1f8   :  { %478 = vsyncadd [#allocation4], 4294967168 }
 0x1f9   :  { %328 = vsyncpa [#allocation3], 1 }
 0x1fa   :  { %329 = vsyncpa [#allocation6], 1 }
 0x1fb   :  { %330 = vsyncpa [#allocation4], 1 }

</bundles_post_ra>
